<compile_context>
chip_gen: v5e
topology: v5e:2x2
jax: 0.10.0
libtpu: 0.0.40
codegen_flags: <defaults>
</compile_context>

<pallas_src>
import jax
import jax.numpy as jnp
from jax import lax
from jax.experimental import pallas as pl
from jax.experimental.pallas import tpu as pltpu


def _vmem_limit_bytes():
    """Per-generation VMEM budget (v7x: 64 MiB, v5e/v6e: 128 MiB)."""
    try:
        cap = int(pltpu.get_tpu_info().vmem_capacity_bytes)
    except Exception:
        cap = 64 * 1024 * 1024
    return int(min(cap * 3 // 4, 96 * 1024 * 1024))


def gcn_mask_forward(x, adj, nei_mask, w0, b0, w1, b1, wm):
    """Whole-graph forward. All operands fit VMEM at these sizes -> no grid."""
    n, nfeat = x.shape
    nhid = w0.shape[1]
    nclass = w1.shape[1]
    f32, bf16 = jnp.float32, jnp.bfloat16

    # ---- lane packing: ng neighbours share the lane dimension per iteration ----
    if nhid <= 128 and 128 % nhid == 0:
        ng = 128 // nhid
        while ng < 8:          # >= 8 neighbours/iter -> sublane-aligned nei rows
            ng *= 2
    else:
        ng = 1                 # TODO(synk): nhid not dividing 128 (unpacked path)
    lanes = ng * nhid

    # ---- pad node count (multiple of 16 for bf16 tiles and of ng for groups) ----
    pad_to = max(16, ng)
    n_pad = ((n + pad_to - 1) // pad_to) * pad_to
    if n_pad != n:
        pz = n_pad - n
        # Keep adj/nei zero-padded: padded nodes stay inert (h_pad != 0 but
        # they are never aggregated from / into and are sliced off at the end).
        x = jnp.pad(x, ((0, pz), (0, 0)))
        adj = jnp.pad(adj, ((0, pz), (0, pz)))
        nei_mask = jnp.pad(nei_mask, ((0, pz), (0, pz)))
    s = n_pad // ng            # number of neighbour groups (loop trip count)

    # group g, lane-slot k  <->  neighbour j = g + k*s
    # neighbour indicator regrouped (NOT expanded): nei_g[g, k, i] = nei[i, g+k*s]
    # f32 (0/1 exact) to keep the in-kernel transposed-LHS matmul on the most
    # robust path; still 16-32x smaller than the old O(N^2*H) nei_rep.
    jcols = (jnp.arange(s)[:, None] + jnp.arange(ng)[None, :] * s).reshape(-1)
    nei_g = jnp.transpose(nei_mask, (1, 0))[jcols].reshape(s, ng, n_pad).astype(f32)

    # fixed helper matrices for the idle MXU:
    #   expand: [ng, lanes]  block-ones -> lane-expands one group of nei columns
    #   fold:   [lanes, nhid] stacked identities -> sums the ng lane slots
    expand = jnp.kron(jnp.eye(ng, dtype=f32), jnp.ones((1, nhid), f32))
    fold = jnp.kron(jnp.ones((ng, 1), f32), jnp.eye(nhid, dtype=f32))

    # fused mask weight: first lanes cols = ng lane-tiled copies of Wm_top, then Wm_bot
    wm_top, wm_bot = wm[:nhid], wm[nhid:]
    wm_all = jnp.concatenate([jnp.tile(wm_top, (1, ng)), wm_bot], axis=1).astype(bf16)

    # class dim padded to lane-dense width; padded logits pinned to -1e30
    c_pad = ((max(nclass, 1) + 127) // 128) * 128
    w1p = jnp.zeros((nhid, c_pad), f32).at[:, :nclass].set(w1.astype(f32)).astype(bf16)
    b1p = jnp.full((1, c_pad), -1e30, f32).at[0, :nclass].set(b1.astype(f32))
    b0_2d = b0.reshape(1, nhid).astype(f32)

    gc1_adj_first = nfeat <= nhid    # cheaper association for gc1 (static choice)
    n_groups = s
    unroll = True if n_groups <= 8 else (2 if n_groups % 2 == 0 else 1)

    def kernel(x_ref, adj_ref, nei_ref, exp_ref, fold_ref,
               w0_ref, b0_ref, w1_ref, b1_ref, wm_ref,
               out_ref, qh_ref, hh_ref):
        xv = x_ref[...]          # bf16
        adjv = adj_ref[...]      # bf16

        # ---- gc1: relu(adj @ x @ W0 + b0); O(N^2) matmul at min(nfeat, nhid) ----
        if gc1_adj_first:
            ax = jnp.dot(adjv, xv, preferred_element_type=jnp.float32)
            pre = jnp.dot(ax.astype(jnp.bfloat16), w0_ref[...],
                          preferred_element_type=jnp.float32)
        else:
            xw = jnp.dot(xv, w0_ref[...], preferred_element_type=jnp.float32)
            pre = jnp.dot(adjv, xw.astype(jnp.bfloat16),
                          preferred_element_type=jnp.float32)
        h = jnp.maximum(pre + b0_ref[...], 0.0)               # [n_pad, nhid] f32
        # TODO(synk): training-mode F.dropout (torch-matching RNG) left as identity.

        # ---- fused mask projections: one MXU call -> [n_pad, lanes + nhid] ----
        pq = jnp.dot(h.astype(jnp.bfloat16), wm_ref[...],
                     preferred_element_type=jnp.float32)
        p_half = 0.5 * pq[:, :lanes]      # ng lane-tiled copies of 0.5*P
        q_half = 0.5 * pq[:, lanes:]      # 0.5*Q
        h_half = 0.5 * h

        # pack 0.5*Q / 0.5*h rows into the lane layout (slot k holds rows [k*s,(k+1)*s))
        for k in range(ng):
            qh_ref[:, k * nhid:(k + 1) * nhid] = q_half[k * s:(k + 1) * s, :]
            hh_ref[:, k * nhid:(k + 1) * nhid] = h_half[k * s:(k + 1) * s, :]

        # ---- masked aggregation: ng neighbours / iter, accumulator in vregs ----
        def body(g, acc):
            nei_rows = nei_ref[g]                              # [ng, n_pad] (0/1)
            # expand indicator columns into the packed lane layout on the idle MXU
            nei_blk = lax.dot_general(
                nei_rows, exp_ref[...],
                dimension_numbers=(((0,), (0,)), ((), ())),
                preferred_element_type=jnp.float32)            # [n_pad, lanes]
            q_row = qh_ref[pl.ds(g, 1), :]                     # [1, lanes]
            h_row = hh_ref[pl.ds(g, 1), :]                     # [1, lanes]
            # sigmoid(P+Q) * h == (0.5*h) * (tanh(0.5*P + 0.5*Q) + 1)
            gate = jnp.tanh(p_half + q_row) + 1.0              # 1 EUP push / elem
            return acc + (nei_blk * h_row) * gate

        acc0 = jnp.zeros((n_pad, lanes), jnp.float32)
        acc = lax.fori_loop(0, n_groups, body, acc0, unroll=unroll)

        # fold the ng lane slots back down to [n_pad, nhid] on the MXU
        agg = jnp.dot(acc, fold_ref[...], preferred_element_type=jnp.float32)
        h_new = h + agg

        # ---- gc2 reassociated: ((adj @ h') @ W1) + b1 (O(N^2) at width nhid) ----
        ah = jnp.dot(adjv, h_new.astype(jnp.bfloat16),
                     preferred_element_type=jnp.float32)
        logits = jnp.dot(ah.astype(jnp.bfloat16), w1_ref[...],
                         preferred_element_type=jnp.float32) + b1_ref[...]

        # ---- log_softmax over classes (padded cols = -1e30 -> exp == 0) ----
        mx = jnp.max(logits, axis=1, keepdims=True)
        z = logits - mx
        lse = jnp.log(jnp.sum(jnp.exp(z), axis=1, keepdims=True))
        out_ref[...] = z - lse

    vmem = pl.BlockSpec(memory_space=pltpu.MemorySpace.VMEM)
    out_pad = pl.pallas_call(
        kernel,
        out_shape=jax.ShapeDtypeStruct((n_pad, c_pad), f32),
        in_specs=[vmem] * 10,
        out_specs=vmem,
        scratch_shapes=[
            pltpu.VMEM((s, lanes), f32),   # packed 0.5*Q rows
            pltpu.VMEM((s, lanes), f32),   # packed 0.5*h rows
        ],
        compiler_params=pltpu.CompilerParams(vmem_limit_bytes=_vmem_limit_bytes()),
    )(x.astype(bf16), adj.astype(bf16), nei_g, expand, fold,
      w0.astype(bf16), b0_2d, w1p, b1p, wm_all)
    return out_pad[:n, :nclass]


def reference_forward(x, adj, nei, w0, b0, w1, b1, wm):
    """Pure-JAX f32 reference of the same semantics (for correctness check)."""
    nhid = w0.shape[1]
    h = jnp.maximum(adj @ (x @ w0) + b0, 0.0)
    P = h @ wm[:nhid]
    Q = h @ wm[nhid:]
    m = jax.nn.sigmoid(P[:, None, :] + Q[None, :, :])            # [N, N, H]
    agg = jnp.sum(nei[:, :, None] * m * h[None, :, :], axis=1)   # [N, H]
    h_new = h + agg
    logits = adj @ (h_new @ w1) + b1
    return jax.nn.log_softmax(logits, axis=1)


if __name__ == "__main__":
    key = jax.random.PRNGKey(0)
    N, nfeat, nhid, nclass = 16, 8, 32, 4
    ks = jax.random.split(key, 7)

    # node features
    x = jax.random.normal(ks[0], (N, nfeat), jnp.float32)

    # random symmetric neighbour structure (no self loops) -> add_all indicator
    a = (jax.random.uniform(ks[1], (N, N)) < 0.3).astype(jnp.float32)
    a = jnp.maximum(a, a.T) * (1.0 - jnp.eye(N, dtype=jnp.float32))
    nei_mask = a
    # row-normalized adjacency with self loops (standard GCN preprocessing)
    adj_hat = a + jnp.eye(N, dtype=jnp.float32)
    adj = adj_hat / jnp.sum(adj_hat, axis=1, keepdims=True)

    # deterministic parameter init (module __init__ only gives shapes)
    w0 = 0.1 * jax.random.normal(ks[2], (nfeat, nhid), jnp.float32)
    b0 = 0.1 * jax.random.normal(ks[3], (nhid,), jnp.float32)
    w1 = 0.1 * jax.random.normal(ks[4], (nhid, nclass), jnp.float32)
    b1 = 0.1 * jax.random.normal(ks[5], (nclass,), jnp.float32)
    wm = 0.1 * jax.random.normal(ks[6], (2 * nhid, nhid), jnp.float32)

    out = gcn_mask_forward(x, adj, nei_mask, w0, b0, w1, b1, wm)
    out = jax.block_until_ready(out)

    ref = reference_forward(x, adj, nei_mask, w0, b0, w1, b1, wm)
    assert out.shape == (N, nclass)
    # bf16 MXU operands (f32 accumulation) -> slightly relaxed tolerance vs f32 ref
    assert jnp.allclose(out, ref, atol=3e-2, rtol=3e-2), "Pallas kernel mismatch vs reference"
    print("KERNEL_OK")
</pallas_src>

<mosaic_0001>
module attributes {stable_mosaic.version = 11 : i64} {
  func.func @kernel(%arg0: memref<16x8xbf16, #tpu.memory_space<vmem>>, %arg1: memref<16x16xbf16, #tpu.memory_space<vmem>>, %arg2: memref<2x8x16xf32, #tpu.memory_space<vmem>>, %arg3: memref<8x256xf32, #tpu.memory_space<vmem>>, %arg4: memref<256x32xf32, #tpu.memory_space<vmem>>, %arg5: memref<8x32xbf16, #tpu.memory_space<vmem>>, %arg6: memref<1x32xf32, #tpu.memory_space<vmem>>, %arg7: memref<32x128xbf16, #tpu.memory_space<vmem>>, %arg8: memref<1x128xf32, #tpu.memory_space<vmem>>, %arg9: memref<32x288xbf16, #tpu.memory_space<vmem>>, %arg10: memref<16x128xf32, #tpu.memory_space<vmem>>, %arg11: memref<2x256xf32, #tpu.memory_space<vmem>>, %arg12: memref<2x256xf32, #tpu.memory_space<vmem>>) attributes {dimension_semantics = [], scalar_prefetch = 0 : i64, scratch_operands = 2 : i64, tpu.core_type = #tpu.core_type<tc>} {
    %c0 = arith.constant 0 : index
    %c0_0 = arith.constant 0 : index
    %0 = vector.load %arg0[%c0, %c0_0] : memref<16x8xbf16, #tpu.memory_space<vmem>>, vector<16x8xbf16>
    %c0_1 = arith.constant 0 : index
    %c0_2 = arith.constant 0 : index
    %1 = vector.load %arg1[%c0_1, %c0_2] : memref<16x16xbf16, #tpu.memory_space<vmem>>, vector<16x16xbf16>
    %cst = arith.constant dense<0.000000e+00> : vector<16x8xf32>
    %2 = tpu.matmul %1, %0, %cst {dimension_numbers = #tpu.dot_dimension_numbers<[1], [0], [0], [1], [0, 0, 1, 1], [], []>} : vector<16x16xbf16>, vector<16x8xbf16>, vector<16x8xf32> -> vector<16x8xf32>
    %3 = arith.truncf %2 : vector<16x8xf32> to vector<16x8xbf16>
    %c0_3 = arith.constant 0 : index
    %c0_4 = arith.constant 0 : index
    %4 = vector.load %arg5[%c0_3, %c0_4] : memref<8x32xbf16, #tpu.memory_space<vmem>>, vector<8x32xbf16>
    %cst_5 = arith.constant dense<0.000000e+00> : vector<16x32xf32>
    %5 = tpu.matmul %3, %4, %cst_5 {dimension_numbers = #tpu.dot_dimension_numbers<[1], [0], [0], [1], [0, 0, 1, 1], [], []>} : vector<16x8xbf16>, vector<8x32xbf16>, vector<16x32xf32> -> vector<16x32xf32>
    %c0_6 = arith.constant 0 : index
    %c0_7 = arith.constant 0 : index
    %6 = vector.load %arg6[%c0_6, %c0_7] : memref<1x32xf32, #tpu.memory_space<vmem>>, vector<1x32xf32>
    %7 = vector.broadcast %6 : vector<1x32xf32> to vector<16x32xf32>
    %8 = arith.addf %5, %7 : vector<16x32xf32>
    %cst_8 = arith.constant 0.000000e+00 : f32
    %9 = vector.broadcast %cst_8 : f32 to vector<16x32xf32>
    %10 = arith.maximumf %8, %9 : vector<16x32xf32>
    %11 = arith.truncf %10 : vector<16x32xf32> to vector<16x32xbf16>
    %c0_9 = arith.constant 0 : index
    %c0_10 = arith.constant 0 : index
    %12 = vector.load %arg9[%c0_9, %c0_10] : memref<32x288xbf16, #tpu.memory_space<vmem>>, vector<32x288xbf16>
    %cst_11 = arith.constant dense<0.000000e+00> : vector<16x288xf32>
    %13 = tpu.matmul %11, %12, %cst_11 {dimension_numbers = #tpu.dot_dimension_numbers<[1], [0], [0], [1], [0, 0, 1, 1], [], []>} : vector<16x32xbf16>, vector<32x288xbf16>, vector<16x288xf32> -> vector<16x288xf32>
    %14 = vector.extract_strided_slice %13 {offsets = [0, 0], sizes = [16, 256], strides = [1, 1]} : vector<16x288xf32> to vector<16x256xf32>
    %cst_12 = arith.constant 5.000000e-01 : f32
    %15 = vector.broadcast %cst_12 : f32 to vector<16x256xf32>
    %16 = arith.mulf %15, %14 : vector<16x256xf32>
    %17 = vector.extract_strided_slice %13 {offsets = [0, 256], sizes = [16, 32], strides = [1, 1]} : vector<16x288xf32> to vector<16x32xf32>
    %cst_13 = arith.constant 5.000000e-01 : f32
    %18 = vector.broadcast %cst_13 : f32 to vector<16x32xf32>
    %19 = arith.mulf %18, %17 : vector<16x32xf32>
    %cst_14 = arith.constant 5.000000e-01 : f32
    %20 = vector.broadcast %cst_14 : f32 to vector<16x32xf32>
    %21 = arith.mulf %20, %10 : vector<16x32xf32>
    %22 = vector.extract_strided_slice %19 {offsets = [0, 0], sizes = [2, 32], strides = [1, 1]} : vector<16x32xf32> to vector<2x32xf32>
    %c0_15 = arith.constant 0 : index
    %c0_16 = arith.constant 0 : index
    %23 = vector.load %arg11[%c0_15, %c0_16] : memref<2x256xf32, #tpu.memory_space<vmem>>, vector<2x32xf32>
    tpu.vector_store %arg11[%c0_15, %c0_16], %22 {strides = array<i32>} : memref<2x256xf32, #tpu.memory_space<vmem>>, vector<2x32xf32>,
    %24 = vector.extract_strided_slice %21 {offsets = [0, 0], sizes = [2, 32], strides = [1, 1]} : vector<16x32xf32> to vector<2x32xf32>
    %c0_17 = arith.constant 0 : index
    %c0_18 = arith.constant 0 : index
    %25 = vector.load %arg12[%c0_17, %c0_18] : memref<2x256xf32, #tpu.memory_space<vmem>>, vector<2x32xf32>
    tpu.vector_store %arg12[%c0_17, %c0_18], %24 {strides = array<i32>} : memref<2x256xf32, #tpu.memory_space<vmem>>, vector<2x32xf32>,
    %26 = vector.extract_strided_slice %19 {offsets = [2, 0], sizes = [2, 32], strides = [1, 1]} : vector<16x32xf32> to vector<2x32xf32>
    %c0_19 = arith.constant 0 : index
    %c32 = arith.constant 32 : index
    %27 = vector.load %arg11[%c0_19, %c32] : memref<2x256xf32, #tpu.memory_space<vmem>>, vector<2x32xf32>
    tpu.vector_store %arg11[%c0_19, %c32], %26 {strides = array<i32>} : memref<2x256xf32, #tpu.memory_space<vmem>>, vector<2x32xf32>,
    %28 = vector.extract_strided_slice %21 {offsets = [2, 0], sizes = [2, 32], strides = [1, 1]} : vector<16x32xf32> to vector<2x32xf32>
    %c0_20 = arith.constant 0 : index
    %c32_21 = arith.constant 32 : index
    %29 = vector.load %arg12[%c0_20, %c32_21] : memref<2x256xf32, #tpu.memory_space<vmem>>, vector<2x32xf32>
    tpu.vector_store %arg12[%c0_20, %c32_21], %28 {strides = array<i32>} : memref<2x256xf32, #tpu.memory_space<vmem>>, vector<2x32xf32>,
    %30 = vector.extract_strided_slice %19 {offsets = [4, 0], sizes = [2, 32], strides = [1, 1]} : vector<16x32xf32> to vector<2x32xf32>
    %c0_22 = arith.constant 0 : index
    %c64 = arith.constant 64 : index
    %31 = vector.load %arg11[%c0_22, %c64] : memref<2x256xf32, #tpu.memory_space<vmem>>, vector<2x32xf32>
    tpu.vector_store %arg11[%c0_22, %c64], %30 {strides = array<i32>} : memref<2x256xf32, #tpu.memory_space<vmem>>, vector<2x32xf32>,
    %32 = vector.extract_strided_slice %21 {offsets = [4, 0], sizes = [2, 32], strides = [1, 1]} : vector<16x32xf32> to vector<2x32xf32>
    %c0_23 = arith.constant 0 : index
    %c64_24 = arith.constant 64 : index
    %33 = vector.load %arg12[%c0_23, %c64_24] : memref<2x256xf32, #tpu.memory_space<vmem>>, vector<2x32xf32>
    tpu.vector_store %arg12[%c0_23, %c64_24], %32 {strides = array<i32>} : memref<2x256xf32, #tpu.memory_space<vmem>>, vector<2x32xf32>,
    %34 = vector.extract_strided_slice %19 {offsets = [6, 0], sizes = [2, 32], strides = [1, 1]} : vector<16x32xf32> to vector<2x32xf32>
    %c0_25 = arith.constant 0 : index
    %c96 = arith.constant 96 : index
    %35 = vector.load %arg11[%c0_25, %c96] : memref<2x256xf32, #tpu.memory_space<vmem>>, vector<2x32xf32>
    tpu.vector_store %arg11[%c0_25, %c96], %34 {strides = array<i32>} : memref<2x256xf32, #tpu.memory_space<vmem>>, vector<2x32xf32>,
    %36 = vector.extract_strided_slice %21 {offsets = [6, 0], sizes = [2, 32], strides = [1, 1]} : vector<16x32xf32> to vector<2x32xf32>
    %c0_26 = arith.constant 0 : index
    %c96_27 = arith.constant 96 : index
    %37 = vector.load %arg12[%c0_26, %c96_27] : memref<2x256xf32, #tpu.memory_space<vmem>>, vector<2x32xf32>
    tpu.vector_store %arg12[%c0_26, %c96_27], %36 {strides = array<i32>} : memref<2x256xf32, #tpu.memory_space<vmem>>, vector<2x32xf32>,
    %38 = vector.extract_strided_slice %19 {offsets = [8, 0], sizes = [2, 32], strides = [1, 1]} : vector<16x32xf32> to vector<2x32xf32>
    %c0_28 = arith.constant 0 : index
    %c128 = arith.constant 128 : index
    %39 = vector.load %arg11[%c0_28, %c128] : memref<2x256xf32, #tpu.memory_space<vmem>>, vector<2x32xf32>
    tpu.vector_store %arg11[%c0_28, %c128], %38 {strides = array<i32>} : memref<2x256xf32, #tpu.memory_space<vmem>>, vector<2x32xf32>,
    %40 = vector.extract_strided_slice %21 {offsets = [8, 0], sizes = [2, 32], strides = [1, 1]} : vector<16x32xf32> to vector<2x32xf32>
    %c0_29 = arith.constant 0 : index
    %c128_30 = arith.constant 128 : index
    %41 = vector.load %arg12[%c0_29, %c128_30] : memref<2x256xf32, #tpu.memory_space<vmem>>, vector<2x32xf32>
    tpu.vector_store %arg12[%c0_29, %c128_30], %40 {strides = array<i32>} : memref<2x256xf32, #tpu.memory_space<vmem>>, vector<2x32xf32>,
    %42 = vector.extract_strided_slice %19 {offsets = [10, 0], sizes = [2, 32], strides = [1, 1]} : vector<16x32xf32> to vector<2x32xf32>
    %c0_31 = arith.constant 0 : index
    %c160 = arith.constant 160 : index
    %43 = vector.load %arg11[%c0_31, %c160] : memref<2x256xf32, #tpu.memory_space<vmem>>, vector<2x32xf32>
    tpu.vector_store %arg11[%c0_31, %c160], %42 {strides = array<i32>} : memref<2x256xf32, #tpu.memory_space<vmem>>, vector<2x32xf32>,
    %44 = vector.extract_strided_slice %21 {offsets = [10, 0], sizes = [2, 32], strides = [1, 1]} : vector<16x32xf32> to vector<2x32xf32>
    %c0_32 = arith.constant 0 : index
    %c160_33 = arith.constant 160 : index
    %45 = vector.load %arg12[%c0_32, %c160_33] : memref<2x256xf32, #tpu.memory_space<vmem>>, vector<2x32xf32>
    tpu.vector_store %arg12[%c0_32, %c160_33], %44 {strides = array<i32>} : memref<2x256xf32, #tpu.memory_space<vmem>>, vector<2x32xf32>,
    %46 = vector.extract_strided_slice %19 {offsets = [12, 0], sizes = [2, 32], strides = [1, 1]} : vector<16x32xf32> to vector<2x32xf32>
    %c0_34 = arith.constant 0 : index
    %c192 = arith.constant 192 : index
    %47 = vector.load %arg11[%c0_34, %c192] : memref<2x256xf32, #tpu.memory_space<vmem>>, vector<2x32xf32>
    tpu.vector_store %arg11[%c0_34, %c192], %46 {strides = array<i32>} : memref<2x256xf32, #tpu.memory_space<vmem>>, vector<2x32xf32>,
    %48 = vector.extract_strided_slice %21 {offsets = [12, 0], sizes = [2, 32], strides = [1, 1]} : vector<16x32xf32> to vector<2x32xf32>
    %c0_35 = arith.constant 0 : index
    %c192_36 = arith.constant 192 : index
    %49 = vector.load %arg12[%c0_35, %c192_36] : memref<2x256xf32, #tpu.memory_space<vmem>>, vector<2x32xf32>
    tpu.vector_store %arg12[%c0_35, %c192_36], %48 {strides = array<i32>} : memref<2x256xf32, #tpu.memory_space<vmem>>, vector<2x32xf32>,
    %50 = vector.extract_strided_slice %19 {offsets = [14, 0], sizes = [2, 32], strides = [1, 1]} : vector<16x32xf32> to vector<2x32xf32>
    %c0_37 = arith.constant 0 : index
    %c224 = arith.constant 224 : index
    %51 = vector.load %arg11[%c0_37, %c224] : memref<2x256xf32, #tpu.memory_space<vmem>>, vector<2x32xf32>
    tpu.vector_store %arg11[%c0_37, %c224], %50 {strides = array<i32>} : memref<2x256xf32, #tpu.memory_space<vmem>>, vector<2x32xf32>,
    %52 = vector.extract_strided_slice %21 {offsets = [14, 0], sizes = [2, 32], strides = [1, 1]} : vector<16x32xf32> to vector<2x32xf32>
    %c0_38 = arith.constant 0 : index
    %c224_39 = arith.constant 224 : index
    %53 = vector.load %arg12[%c0_38, %c224_39] : memref<2x256xf32, #tpu.memory_space<vmem>>, vector<2x32xf32>
    tpu.vector_store %arg12[%c0_38, %c224_39], %52 {strides = array<i32>} : memref<2x256xf32, #tpu.memory_space<vmem>>, vector<2x32xf32>,
    %cst_40 = arith.constant 0.000000e+00 : f32
    %54 = vector.broadcast %cst_40 : f32 to vector<16x256xf32>
    %c0_i32 = arith.constant 0 : i32
    %55 = arith.index_cast %c0_i32 : i32 to index
    %c0_41 = arith.constant 0 : index
    %c0_42 = arith.constant 0 : index
    %56 = vector.load %arg2[%55, %c0_41, %c0_42] : memref<2x8x16xf32, #tpu.memory_space<vmem>>, vector<1x8x16xf32>
    %57 = vector.shape_cast %56 : vector<1x8x16xf32> to vector<8x16xf32>
    %c0_43 = arith.constant 0 : index
    %c0_44 = arith.constant 0 : index
    %58 = vector.load %arg3[%c0_43, %c0_44] : memref<8x256xf32, #tpu.memory_space<vmem>>, vector<8x256xf32>
    %cst_45 = arith.constant dense<0.000000e+00> : vector<16x256xf32>
    %59 = tpu.matmul %57, %58, %cst_45 {dimension_numbers = #tpu.dot_dimension_numbers<[0], [0], [1], [1], [0, 1, 1, 1], [], []>} : vector<8x16xf32>, vector<8x256xf32>, vector<16x256xf32> -> vector<16x256xf32>
    %60 = arith.index_cast %c0_i32 : i32 to index
    %c0_46 = arith.constant 0 : index
    %61 = vector.load %arg11[%60, %c0_46] : memref<2x256xf32, #tpu.memory_space<vmem>>, vector<1x256xf32>
    %62 = arith.index_cast %c0_i32 : i32 to index
    %c0_47 = arith.constant 0 : index
    %63 = vector.load %arg12[%62, %c0_47] : memref<2x256xf32, #tpu.memory_space<vmem>>, vector<1x256xf32>
    %64 = vector.broadcast %61 : vector<1x256xf32> to vector<16x256xf32>
    %65 = arith.addf %16, %64 : vector<16x256xf32>
    %66 = math.tanh %65 : vector<16x256xf32>
    %cst_48 = arith.constant 1.000000e+00 : f32
    %67 = vector.broadcast %cst_48 : f32 to vector<16x256xf32>
    %68 = arith.addf %66, %67 : vector<16x256xf32>
    %69 = vector.broadcast %63 : vector<1x256xf32> to vector<16x256xf32>
    %70 = arith.mulf %59, %69 : vector<16x256xf32>
    %71 = arith.mulf %70, %68 : vector<16x256xf32>
    %72 = arith.addf %54, %71 : vector<16x256xf32>
    %c1_i32 = arith.constant 1 : i32
    %73 = arith.index_cast %c1_i32 : i32 to index
    %c0_49 = arith.constant 0 : index
    %c0_50 = arith.constant 0 : index
    %74 = vector.load %arg2[%73, %c0_49, %c0_50] : memref<2x8x16xf32, #tpu.memory_space<vmem>>, vector<1x8x16xf32>
    %75 = vector.shape_cast %74 : vector<1x8x16xf32> to vector<8x16xf32>
    %c0_51 = arith.constant 0 : index
    %c0_52 = arith.constant 0 : index
    %76 = vector.load %arg3[%c0_51, %c0_52] : memref<8x256xf32, #tpu.memory_space<vmem>>, vector<8x256xf32>
    %cst_53 = arith.constant dense<0.000000e+00> : vector<16x256xf32>
    %77 = tpu.matmul %75, %76, %cst_53 {dimension_numbers = #tpu.dot_dimension_numbers<[0], [0], [1], [1], [0, 1, 1, 1], [], []>} : vector<8x16xf32>, vector<8x256xf32>, vector<16x256xf32> -> vector<16x256xf32>
    %78 = arith.index_cast %c1_i32 : i32 to index
    %c0_54 = arith.constant 0 : index
    %79 = vector.load %arg11[%78, %c0_54] : memref<2x256xf32, #tpu.memory_space<vmem>>, vector<1x256xf32>
    %80 = arith.index_cast %c1_i32 : i32 to index
    %c0_55 = arith.constant 0 : index
    %81 = vector.load %arg12[%80, %c0_55] : memref<2x256xf32, #tpu.memory_space<vmem>>, vector<1x256xf32>
    %82 = vector.broadcast %79 : vector<1x256xf32> to vector<16x256xf32>
    %83 = arith.addf %16, %82 : vector<16x256xf32>
    %84 = math.tanh %83 : vector<16x256xf32>
    %cst_56 = arith.constant 1.000000e+00 : f32
    %85 = vector.broadcast %cst_56 : f32 to vector<16x256xf32>
    %86 = arith.addf %84, %85 : vector<16x256xf32>
    %87 = vector.broadcast %81 : vector<1x256xf32> to vector<16x256xf32>
    %88 = arith.mulf %77, %87 : vector<16x256xf32>
    %89 = arith.mulf %88, %86 : vector<16x256xf32>
    %90 = arith.addf %72, %89 : vector<16x256xf32>
    %c2_i32 = arith.constant 2 : i32
    %c0_57 = arith.constant 0 : index
    %c0_58 = arith.constant 0 : index
    %91 = vector.load %arg4[%c0_57, %c0_58] : memref<256x32xf32, #tpu.memory_space<vmem>>, vector<256x32xf32>
    %cst_59 = arith.constant dense<0.000000e+00> : vector<16x32xf32>
    %92 = tpu.matmul %90, %91, %cst_59 {dimension_numbers = #tpu.dot_dimension_numbers<[1], [0], [0], [1], [0, 0, 1, 1], [], []>} : vector<16x256xf32>, vector<256x32xf32>, vector<16x32xf32> -> vector<16x32xf32>
    %93 = arith.addf %10, %92 : vector<16x32xf32>
    %94 = arith.truncf %93 : vector<16x32xf32> to vector<16x32xbf16>
    %cst_60 = arith.constant dense<0.000000e+00> : vector<16x32xf32>
    %95 = tpu.matmul %1, %94, %cst_60 {dimension_numbers = #tpu.dot_dimension_numbers<[1], [0], [0], [1], [0, 0, 1, 1], [], []>} : vector<16x16xbf16>, vector<16x32xbf16>, vector<16x32xf32> -> vector<16x32xf32>
    %96 = arith.truncf %95 : vector<16x32xf32> to vector<16x32xbf16>
    %c0_61 = arith.constant 0 : index
    %c0_62 = arith.constant 0 : index
    %97 = vector.load %arg7[%c0_61, %c0_62] : memref<32x128xbf16, #tpu.memory_space<vmem>>, vector<32x128xbf16>
    %cst_63 = arith.constant dense<0.000000e+00> : vector<16x128xf32>
    %98 = tpu.matmul %96, %97, %cst_63 {dimension_numbers = #tpu.dot_dimension_numbers<[1], [0], [0], [1], [0, 0, 1, 1], [], []>} : vector<16x32xbf16>, vector<32x128xbf16>, vector<16x128xf32> -> vector<16x128xf32>
    %c0_64 = arith.constant 0 : index
    %c0_65 = arith.constant 0 : index
    %99 = vector.load %arg8[%c0_64, %c0_65] : memref<1x128xf32, #tpu.memory_space<vmem>>, vector<1x128xf32>
    %100 = vector.broadcast %99 : vector<1x128xf32> to vector<16x128xf32>
    %101 = arith.addf %98, %100 : vector<16x128xf32>
    %cst_66 = arith.constant dense<0xFF800000> : vector<16xf32>
    %102 = vector.multi_reduction <maximumf>, %101, %cst_66 [1] : vector<16x128xf32> to vector<16xf32>
    %103 = vector.shape_cast %102 : vector<16xf32> to vector<16x1xf32>
    %104 = vector.broadcast %103 : vector<16x1xf32> to vector<16x128xf32>
    %105 = arith.subf %101, %104 : vector<16x128xf32>
    %106 = math.exp %105 : vector<16x128xf32>
    %cst_67 = arith.constant dense<0.000000e+00> : vector<16xf32>
    %107 = vector.multi_reduction <add>, %106, %cst_67 [1] : vector<16x128xf32> to vector<16xf32>
    %108 = vector.shape_cast %107 : vector<16xf32> to vector<16x1xf32>
    %109 = math.log %108 : vector<16x1xf32>
    %110 = vector.broadcast %109 : vector<16x1xf32> to vector<16x128xf32>
    %111 = arith.subf %105, %110 : vector<16x128xf32>
    %c0_68 = arith.constant 0 : index
    %c0_69 = arith.constant 0 : index
    %112 = vector.load %arg10[%c0_68, %c0_69] : memref<16x128xf32, #tpu.memory_space<vmem>>, vector<16x128xf32>
    tpu.vector_store %arg10[%c0_68, %c0_69], %111 {strides = array<i32>} : memref<16x128xf32, #tpu.memory_space<vmem>>, vector<16x128xf32>,
    return
  }
}

</mosaic_0001>

<bundles_post_ra>
// kernel: tpu_custom_call.1
= control target key start
LH: loop header
LB: loop body
LE: loop exit
PB: predicated region body
PF: predicated region fallthrough
CT: control target
= control target key end

     0   :  { %s1128_s0 = inlined_call_operand.vmem [shape: bf16[16,8], index: 0, kind: input, shape index: {}]   ;;  %s1129_s1 = inlined_call_operand.vmem [shape: bf16[16,16], index: 1, kind: input, shape index: {}]   ;;  %s1130_s2 = inlined_call_operand.vmem [shape: f32[2,8,16], index: 2, kind: input, shape index: {}]   ;;  %s1131_s3 = inlined_call_operand.vmem [shape: f32[8,256], index: 3, kind: input, shape index: {}]   ;;  %s1132_s4 = inlined_call_operand.vmem [shape: f32[256,32], index: 4, kind: input, shape index: {}]   ;;  %s1133_s5 = inlined_call_operand.vmem [shape: bf16[8,32], index: 5, kind: input, shape index: {}]   ;;  %s1134_s6 = inlined_call_operand.vmem [shape: f32[1,32], index: 6, kind: input, shape index: {}]   ;;  %s1135_s7 = inlined_call_operand.vmem [shape: bf16[32,128], index: 7, kind: input, shape index: {}]   ;;  %s1136_s8 = inlined_call_operand.vmem [shape: f32[1,128], index: 8, kind: input, shape index: {}]   ;;  %s1137_s9 = inlined_call_operand.vmem [shape: bf16[32,288], index: 9, kind: input, shape index: {}]   ;;  %s1138_s10 = inlined_call_operand.hbm [shape: f32[16,128], index: 10, kind: output, shape index: {}]  }
   0x1   :  { %v767_v0 = vld [vmem:[%s1128_s0] sm:$0xff] }
   0x2   :  { %v903_v1 = vld [vmem:[%s1129_s1] sm:$0xff] }
   0x3   :  { %15 = vsyncpa [#allocation5], 0  ;;  %63 = vmatpush.bf16.msra.mxu0 %v767_v0  ;;  %vm52_vm0 = vcmask 130048   ;;  %v71_v2 = vld [vmem:[%s1133_s5] sm:$0xf]  ;;  %vm80_vm1 = vcmask 1043456  }
   0x4   :  { %v82_v3 = vsel %vm80_vm1, %v71_v2, 0  ;;  %vm76_vm2 = vcmask 64512   ;;  %v735_v7 = vld [vmem:[%s1137_s9 + $0x18] sm:$0xf]  ;;  %v773_v8 = vld [vmem:[%s1137_s9 + $0x20] sm:$0xf0] }
   0x5   :  { %91 = vmatpush.bf16.msra.mxu1 %v82_v3  ;;  %v772_v9 = vld [vmem:[%s1137_s9 + $0x1c] sm:$0xf]  ;;  %v736_v10 = vor.u32 %v773_v8, %v735_v7  ;;  %v737_v11 = vld [vmem:[%s1137_s9 + $0x24] sm:$0xf0]  ;;  %v743_v12 = vld [vmem:[%s1137_s9 + $0x20] sm:$0xf] }
   0x6   :  { %719 = vmatmul.msk.bf16.vlgmr.msra.gmra.mxu0 %vm52_vm0, %v903_v1  ;;  %v774_v13 = vld [vmem:[%s1137_s9 + $0x28] sm:$0xf0]  ;;  %v740_v14 = vor.u32 %v772_v9, %v737_v11  ;;  %v723_v16 = vld [vmem:[%s1137_s9] sm:$0xf]  ;;  %v769_v18 = vld [vmem:[%s1137_s9 + $0x4] sm:$0xf] }
   0x7   :  { %v744_v15 = vor.u32 %v774_v13, %v743_v12  ;;  %151 = vmatpush.bf16.msra.mxu2 %v736_v10  ;;  %v770_v17 = vld [vmem:[%s1137_s9 + $0x8] sm:$0xf0]  ;;  %v725_v20 = vld [vmem:[%s1137_s9 + $0xc] sm:$0xf0]  ;;  %v731_v21 = vld [vmem:[%s1137_s9 + $0x8] sm:$0xf] }
   0x8   :  { %165 = vmatpush.bf16.msra.mxu3 %v740_v14  ;;  %v724_v19 = vor.u32 %v770_v17, %v723_v16  ;;  %v771_v22 = vld [vmem:[%s1137_s9 + $0x10] sm:$0xf0]  ;;  %v728_v23 = vor.u32 %v769_v18, %v725_v20  ;;  %v291_v25 = vld [vmem:[%s1130_s2] sm:$0xff]  ;;  %v752_v27 = vld [vmem:[%s1130_s2 + $0x8] sm:$0xff]  ;;  %vm195_vm3 = vcmask 254976   ;;  %vm141_vm4 = vcmask 261120  }
   0x9   :  { %179 = vmatpush.bf16.msrb.mxu0 %v744_v15  ;;  %v732_v24 = vor.u32 %v771_v22, %v731_v21  ;;  %294 = vxpose.xlu0.b32.start.end [1/1] (short) (narrow) %v291_v25, 16  ;;  %v784_v26 = vld [vmem:[%s1134_s6] ss:$0 sm:$0xff]  ;;  %s836_s2 = smov 32   ;;  %s837_s6 = smov 64   ;;  %v293_v49 = vld [vmem:[%s1131_s3 + $0x8] sm:$0xff] }
   0xa   :  { %s838_s9 = smov 96   ;;  %v292_v48 = vld [vmem:[%s1131_s3] sm:$0xff]  ;;  %vm205_vm5 = vcmask 517376   ;;  %vm221_vm6 = vcmask 779776   ;;  %vm236_vm7 = vcmask 1042176   ;;  %v553_v63 = vld [vmem:[%s1132_s4 + $0x78] sm:$0xff] }
   0xb   :  { %152 = vmatpush.bf16.msra.mxu2 %v724_v19  ;;  %347 = vmatpush.msrb.mxu1 %v292_v48  ;;  %v569_v0 = vld [vmem:[%s1132_s4 + $0xf8] sm:$0xff]  ;;  %v552_v2 = vld [vmem:[%s1132_s4 + $0x70] sm:$0xff]  ;;  %v566_v7 = vld [vmem:[%s1132_s4 + $0xe0] sm:$0xff]  ;;  %s699_s21 = sshll.u32 %s1138_s10, 4  ;;  %s840_s22 = smov 128   ;;  %s700_s21 = int_to_ptr.hbm [resolvable:$true] %s699_s21 }
   0xc   :  { %166 = vmatpush.bf16.msra.mxu3 %v728_v23  ;;  %v568_v3 = vld [vmem:[%s1132_s4 + $0xf0] sm:$0xff]  ;;  %v549_v10 = vld [vmem:[%s1132_s4 + $0x58] sm:$0xff]  ;;  %v547_v14 = vld [vmem:[%s1132_s4 + $0x48] sm:$0xff]  ;;  %s841_s5 = smov 8  }
   0xd   :  { %180 = vmatpush.bf16.msrb.mxu0 %v732_v24  ;;  %v565_v11 = vld [vmem:[%s1132_s4 + $0xd8] sm:$0xff]  ;;  %v548_v12 = vld [vmem:[%s1132_s4 + $0x50] sm:$0xff]  ;;  %v563_v15 = vld [vmem:[%s1132_s4 + $0xc8] sm:$0xff] }
   0xe   :  { %v564_v13 = vld [vmem:[%s1132_s4 + $0xd0] sm:$0xff]  ;;  %v546_v16 = vld [vmem:[%s1132_s4 + $0x40] sm:$0xff]  ;;  %v545_v20 = vld [vmem:[%s1132_s4 + $0x38] sm:$0xff] }
   0xf   :  { %370 = vmatpush.msrb.mxu2 %v293_v49  ;;  %v562_v19 = vld [vmem:[%s1132_s4 + $0xc0] sm:$0xff]  ;;  %v561_v21 = vld [vmem:[%s1132_s4 + $0xb8] sm:$0xff]  ;;  %v544_v23 = vld [vmem:[%s1132_s4 + $0x30] sm:$0xff] }
  0x10   :  { %469 = vmatpush.msrb.mxu3 %v292_v48  ;;  %v560_v24 = vld [vmem:[%s1132_s4 + $0xb0] sm:$0xff]  ;;  %v543_v25 = vld [vmem:[%s1132_s4 + $0x28] sm:$0xff] }
  0x11   :  { %492 = vmatpush.msra.mxu0 %v293_v49 }
  0x19   :  { %416 = vxpose.xlu0.b32.start.end [1/1] (short) (narrow) %v752_v27, 16  ;;  %v542_v27 = vld [vmem:[%s1132_s4 + $0x20] sm:$0xff] }
  0x83   :  { %v65_v4 = vpop.f32.mrf.mxu0 }
  0x8b   :  { %v67_v5 = vpop.f32.mrf.mxu0 }
  0x8c   :  { %v70_v6 = vpack.c.bf16 %v67_v5, %v65_v4  ;;  %v551_v4 = vld [vmem:[%s1132_s4 + $0x68] sm:$0xff] }
  0x8d   :  { %v567_v5 = vld [vmem:[%s1132_s4 + $0xe8] sm:$0xff] }
  0x8e   :  { %720 = vmatmul.msk.bf16.vlgmr.msra.gmra.mxu1 %vm76_vm2, %v70_v6  ;;  %v550_v6 = vld [vmem:[%s1132_s4 + $0x60] sm:$0xff] }
  0x8f   :  { %570 = vmatpush.msra.mxu1 %v553_v63 }
  0x91   :  { %571 = vmatpush.msra.mxu1 %v552_v2 }
  0x93   :  { %572 = vmatpush.msra.mxu1 %v551_v4 }
  0x95   :  { %573 = vmatpush.msra.mxu1 %v550_v6 }
  0x97   :  { %574 = vmatpush.msra.mxu1 %v549_v10 }
  0x99   :  { %575 = vmatpush.msra.mxu1 %v548_v12 }
  0x9b   :  { %576 = vmatpush.msra.mxu1 %v547_v14 }
  0x9d   :  { %577 = vmatpush.msra.mxu1 %v546_v16 }
  0x9f   :  { %578 = vmatpush.msra.mxu1 %v545_v20 }
  0xa1   :  { %579 = vmatpush.msra.mxu1 %v544_v23 }
  0xa3   :  { %580 = vmatpush.msra.mxu1 %v543_v25 }
  0xa5   :  { %581 = vmatpush.msra.mxu1 %v542_v27 }
  0xad   :  { %v310_v44 = vpop.trf.xlu0 }
  0xae   :  { %748 = vmatmul.msk.f32.vlgmr.msrb.gmra.mxu1 %vm76_vm2, %v310_v44 }
  0xb5   :  { %v311_v46 = vpop.trf.xlu0 }
  0xb6   :  { %749 = vmatmul.msk.f32.gmra.mxu1 %vm76_vm2, %v311_v46 }
  0xbd   :  { %v432_v50 = vpop.trf.xlu0 }
  0xc5   :  { %v433_v52 = vpop.trf.xlu0 }
 0x10b   :  { %v93_v28 = vpop.f32.mrf.mxu1 }
 0x10c   :  { %v94_v29 = vadd.f32 %v784_v26, %v93_v28  ;;  %v558_v28 = vld [vmem:[%s1132_s4 + $0xa0] sm:$0xff] }
 0x10e   :  { %v956_v30 = vmax.f32 %v94_v29, 0.0 }
 0x110   :  { %v193_v31 = vmul.f32 0.5, %v956_v30 }
 0x112   :  { %197 = vst.msk [vmem:[#allocation3] sm:$0x3] %vm195_vm3, %v193_v31 }
 0x113   :  { %v95_v32 = vpop.f32.mrf.mxu1 }
 0x114   :  { %v96_v33 = vadd.f32 %v784_v26, %v95_v32  ;;  %v559_v26 = vld [vmem:[%s1132_s4 + $0xa8] sm:$0xff] }
 0x116   :  { %v960_v34 = vmax.f32 %v96_v33, 0.0  ;;  %v541_v33 = vld [vmem:[%s1132_s4 + $0x18] sm:$0xff] }
 0x117   :  { %582 = vmatpush.msra.mxu1 %v541_v33 }
 0x118   :  { %v963_v35 = vmul.f32 0.5, %v960_v34  ;;  %v100_v36 = vpack.c.bf16 %v960_v34, %v956_v30 }
 0x11a   :  { %745 = vmatmul.msk.bf16.vlgmr.msra.gmra.mxu2 %vm141_vm4, %v100_v36  ;;  %746 = vmatmul.msk.bf16.vlgmr.msra.gmra.mxu3 %vm141_vm4, %v100_v36  ;;  %246 = vst.msk [vmem:[#allocation3 + $0x2] sm:$0x3] %vm195_vm3, %v963_v35 }
 0x11b   :  { %747 = vmatmul.msk.bf16.vlgmr.msrb.gmra.mxu0 %vm141_vm4, %v100_v36  ;;  %593 = vmatpush.msra.mxu2 %v569_v0  ;;  %v540_v36 = vld [vmem:[%s1132_s4 + $0x10] sm:$0xff] }
 0x11c   :  { %583 = vmatpush.msra.mxu1 %v540_v36 }
 0x11d   :  { %594 = vmatpush.msra.mxu2 %v568_v3 }
 0x11f   :  { %595 = vmatpush.msra.mxu2 %v567_v5 }
 0x121   :  { %596 = vmatpush.msra.mxu2 %v566_v7 }
 0x123   :  { %597 = vmatpush.msra.mxu2 %v565_v11 }
 0x125   :  { %598 = vmatpush.msra.mxu2 %v564_v13 }
 0x127   :  { %599 = vmatpush.msra.mxu2 %v563_v15 }
 0x129   :  { %600 = vmatpush.msra.mxu2 %v562_v19 }
 0x12a   :  { %750 = vmatmul.msk.f32.vlgmr.msrb.gmra.mxu2 %vm76_vm2, %v310_v44  ;;  %753 = vmatmul.msk.f32.vlgmr.msrb.gmra.mxu3 %vm76_vm2, %v432_v50 }
 0x12b   :  { %755 = vmatmul.msk.f32.vlgmr.msra.gmra.mxu0 %vm76_vm2, %v432_v50  ;;  %601 = vmatpush.msra.mxu2 %v561_v21  ;;  %v349_v2 = vpop.f32.mrf.mxu1 }
 0x12d   :  { %602 = vmatpush.msra.mxu2 %v560_v24 }
 0x12f   :  { %603 = vmatpush.msra.mxu2 %v559_v26 }
 0x131   :  { %604 = vmatpush.msra.mxu2 %v558_v28 }
 0x132   :  { %751 = vmatmul.msk.f32.gmra.mxu2 %vm76_vm2, %v311_v46  ;;  %754 = vmatmul.msk.f32.gmra.mxu3 %vm76_vm2, %v433_v52 }
 0x133   :  { %756 = vmatmul.msk.f32.gmra.mxu0 %vm76_vm2, %v433_v52  ;;  %v352_v33 = vpop.f32.mrf.mxu1 }
 0x198   :  { %v182_v37 = vpop.f32.mrf.mxu0 }
 0x199   :  { %v191_v38 = vmul.f32 0.5, %v182_v37  ;;  %v556_v37 = vld [vmem:[%s1132_s4 + $0x90] sm:$0xff] }
 0x19b   :  { %199 = vst.sshfl [vmem:[#allocation1] sm:$0xff pattern:$0x73625140] %v191_v38 }
 0x19c   :  { %196 = vst.msk [vmem:[#allocation2] sm:$0x3] %vm195_vm3, %v191_v38 }
 0x19d   :  { %v168_v29 = vpop.f32.mrf.mxu3 }
 0x1a0   :  { %v184_v39 = vpop.f32.mrf.mxu0 }
 0x1a1   :  { %v192_v40 = vmul.f32 0.5, %v184_v39  ;;  %v539_v39 = vld [vmem:[%s1132_s4 + $0x8] sm:$0xff] }
 0x1a2   :  { %v201_v41 = vld [vmem:[#allocation1 + $0x1] ss:$4 sm:$0xff]  ;;  %584 = vmatpush.msra.mxu1 %v539_v39 }
 0x1a3   :  { %208 = vst.sshfl [vmem:[#allocation1] sm:$0xff pattern:$0x73625140] %v193_v31  ;;  %202 = vrot.lane.b32.xlu1 %v201_v41, %s836_s2  ;;  %v538_v41 = vld [vmem:[%s1132_s4] sm:$0xff] }
 0x1a4   :  { %245 = vst.msk [vmem:[#allocation2 + $0x2] sm:$0x3] %vm195_vm3, %v192_v40  ;;  %585 = vmatpush.msra.mxu1 %v538_v41 }
 0x1a5   :  { %v170_v48 = vpop.f32.mrf.mxu3 }
 0x1a8   :  { %v494_v63 = vpop.f32.mrf.mxu0 }
 0x1aa   :  { %v210_v42 = vld [vmem:[#allocation1 + $0x1] ss:$4 sm:$0xff] }
 0x1ab   :  { %215 = vst.sshfl [vmem:[#allocation1] sm:$0xff pattern:$0x73625140] %v191_v38  ;;  %211 = vrot.lane.b32.xlu0 %v210_v42, %s836_s2  ;;  %v554_v42 = vld [vmem:[%s1132_s4 + $0x80] sm:$0xff] }
 0x1b2   :  { %v217_v43 = vld [vmem:[#allocation1 + $0x2] ss:$4 sm:$0xff] }
 0x1b3   :  { %223 = vst.sshfl [vmem:[#allocation1] sm:$0xff pattern:$0x73625140] %v193_v31  ;;  %218 = vrot.lane.b32.xlu2 %v217_v43, %s837_s6 }
 0x1ba   :  { %v225_v45 = vld [vmem:[#allocation1 + $0x2] ss:$4 sm:$0xff] }
 0x1bb   :  { %230 = vst.sshfl [vmem:[#allocation1] sm:$0xff pattern:$0x73625140] %v191_v38  ;;  %v154_v38 = vpop.f32.mrf.mxu2 }
 0x1bc   :  { %v187_v50 = vmul.f32 0.5, %v154_v38 }
 0x1c2   :  { %v232_v47 = vld [vmem:[#allocation1 + $0x3] ss:$4 sm:$0xff] }
 0x1c3   :  { %233 = vrot.lane.b32.xlu1 %v232_v47, %s838_s9  ;;  %238 = vst.sshfl [vmem:[#allocation1] sm:$0xff pattern:$0x73625140] %v193_v31  ;;  %v188_v47 = vmul.f32 0.5, %v168_v29  ;;  %v156_v52 = vpop.f32.mrf.mxu2 }
 0x1ca   :  { %v240_v51 = vld [vmem:[#allocation1 + $0x3] ss:$4 sm:$0xff] }
 0x1cb   :  { %248 = vst.sshfl [vmem:[#allocation1] sm:$0xff pattern:$0x73625140] %v192_v40  ;;  %v372_v4 = vpop.f32.mrf.mxu2 }
 0x1d2   :  { %v250_v53 = vld [vmem:[#allocation1 + $0x1] ss:$4 sm:$0xff] }
 0x1d3   :  { %251 = vrot.lane.b32.xlu1 %v250_v53, %s836_s2  ;;  %256 = vst.sshfl [vmem:[#allocation1] sm:$0xff pattern:$0x73625140] %v963_v35  ;;  %v375_v38 = vpop.f32.mrf.mxu2 }
 0x1da   :  { %v258_v54 = vld [vmem:[#allocation1 + $0x1] ss:$4 sm:$0xff] }
 0x1db   :  { %259 = vrot.lane.b32.xlu1 %v258_v54, %s836_s2  ;;  %263 = vst.sshfl [vmem:[#allocation1] sm:$0xff pattern:$0x73625140] %v192_v40 }
 0x1e2   :  { %v265_v55 = vld [vmem:[#allocation1 + $0x2] ss:$4 sm:$0xff] }
 0x1e3   :  { %266 = vrot.lane.b32.xlu2 %v265_v55, %s837_s6  ;;  %270 = vst.sshfl [vmem:[#allocation1] sm:$0xff pattern:$0x73625140] %v963_v35 }
 0x1ea   :  { %v272_v56 = vld [vmem:[#allocation1 + $0x2] ss:$4 sm:$0xff] }
 0x1eb   :  { %273 = vrot.lane.b32.xlu1 %v272_v56, %s837_s6  ;;  %277 = vst.sshfl [vmem:[#allocation1] sm:$0xff pattern:$0x73625140] %v192_v40  ;;  %v555_v40 = vld [vmem:[%s1132_s4 + $0x88] sm:$0xff]  ;;  %v189_v56 = vmul.f32 0.5, %v156_v52 }
 0x1f2   :  { %v279_v57 = vld [vmem:[#allocation1 + $0x3] ss:$4 sm:$0xff] }
 0x1f3   :  { %280 = vrot.lane.b32.xlu2 %v279_v57, %s838_s9  ;;  %284 = vst.sshfl [vmem:[#allocation1] sm:$0xff pattern:$0x73625140] %v963_v35  ;;  %v557_v35 = vld [vmem:[%s1132_s4 + $0x98] sm:$0xff] }
 0x1f4   :  { %605 = vmatpush.msra.mxu2 %v557_v35 }
 0x1f6   :  { %606 = vmatpush.msra.mxu2 %v556_v37 }
 0x1f8   :  { %607 = vmatpush.msra.mxu2 %v555_v40 }
 0x1fa   :  { %v286_v58 = vld [vmem:[#allocation1 + $0x3] ss:$4 sm:$0xff]  ;;  %608 = vmatpush.msra.mxu2 %v554_v42 }
 0x1fb   :  { %226 = vrot.lane.b32.xlu2 %v225_v45, %s837_s6  ;;  %287 = vrot.lane.b32.xlu1 %v286_v58, %s838_s9  ;;  %v190_v58 = vmul.f32 0.5, %v170_v48 }
 0x203   :  { %241 = vrot.lane.b32.xlu2 %v240_v51, %s838_s9 }
 0x20d   :  { %v219_v60 = vpop.permute.xlu2 %218 }
 0x215   :  { %v203_v59 = vpop.permute.xlu1 %202 }
 0x216   :  { %206 = vst.msk [vmem:[#allocation2] sm:$0x3] %vm205_vm5, %v203_v59 }
 0x217   :  { %222 = vst.msk [vmem:[#allocation2] sm:$0x3] %vm221_vm6, %v219_v60 }
 0x21d   :  { %v212_v61 = vpop.permute.xlu0 %211 }
 0x21e   :  { %214 = vst.msk [vmem:[#allocation3] sm:$0x3] %vm205_vm5, %v212_v61  ;;  %v471_v61 = vpop.f32.mrf.mxu3 }
 0x226   :  { %v474_v25 = vpop.f32.mrf.mxu3 }
 0x235   :  { %v234_v62 = vpop.permute.xlu1 %233 }
 0x236   :  { %237 = vst.msk [vmem:[#allocation2] sm:$0x3] %vm236_vm7, %v234_v62 }
 0x23d   :  { %v267_v8 = vpop.permute.xlu2 %266 }
 0x245   :  { %v252_v9 = vpop.permute.xlu1 %251 }
 0x246   :  { %254 = vst.msk [vmem:[#allocation2 + $0x2] sm:$0x3] %vm205_vm5, %v252_v9 }
 0x247   :  { %269 = vst.msk [vmem:[#allocation2 + $0x2] sm:$0x3] %vm221_vm6, %v267_v8 }
 0x24d   :  { %v260_v17 = vpop.permute.xlu1 %259  ;;  %v281_v18 = vpop.permute.xlu2 %280 }
 0x24e   :  { %262 = vst.msk [vmem:[#allocation3 + $0x2] sm:$0x3] %vm205_vm5, %v260_v17 }
 0x24f   :  { %283 = vst.msk [vmem:[#allocation2 + $0x2] sm:$0x3] %vm236_vm7, %v281_v18 }
 0x255   :  { %v227_v22 = vpop.permute.xlu2 %226 }
 0x256   :  { %229 = vst.msk [vmem:[#allocation3] sm:$0x3] %vm221_vm6, %v227_v22  ;;  %v378_v43 = vld [vmem:[#allocation2] ss:$2 sm:$0x3] }
 0x257   :  { %v501_v44 = vld [vmem:[#allocation2 + $0x1] ss:$2 sm:$0x3]  ;;  %v382_v45 = vperm.slane %v378_v43, 1  ;;  %v381_v46 = vperm.slane %v378_v43, 0 }
 0x258   :  { %v505_v49 = vperm.slane %v501_v44, 0  ;;  %v506_v51 = vperm.slane %v501_v44, 1 }
 0x259   :  { %v386_v53 = vadd.f32 %v382_v45, %v188_v47  ;;  %v385_v54 = vadd.f32 %v381_v46, %v187_v50  ;;  %v387_v60 = vadd.f32 %v381_v46, %v189_v56  ;;  %v388_v62 = vadd.f32 %v382_v45, %v190_v58 }
 0x25a   :  { %v509_v55 = vadd.f32 %v505_v49, %v187_v50  ;;  %v510_v57 = vadd.f32 %v506_v51, %v188_v47  ;;  %v511_v0 = vadd.f32 %v505_v49, %v189_v56  ;;  %v512_v3 = vadd.f32 %v506_v51, %v190_v58 }
 0x25b   :  { %786 = vtanh.f32 %v386_v53 }
 0x25c   :  { %788 = vtanh.f32 %v385_v54 }
 0x25d   :  { %v274_v31 = vpop.permute.xlu1 %273  ;;  %v242_v32 = vpop.permute.xlu2 %241  ;;  %790 = vtanh.f32 %v509_v55 }
 0x25e   :  { %276 = vst.msk [vmem:[#allocation3 + $0x2] sm:$0x3] %vm221_vm6, %v274_v31  ;;  %792 = vtanh.f32 %v510_v57  ;;  %v497_v31 = vpop.f32.mrf.mxu0 }
 0x25f   :  { %244 = vst.msk [vmem:[#allocation3] sm:$0x3] %vm236_vm7, %v242_v32  ;;  %794 = vtanh.f32 %v387_v60 }
 0x260   :  { %796 = vtanh.f32 %v388_v62  ;;  %v776_v62 = vld [vmem:[%s1135_s7 + $0x8] sm:$0xff] }
 0x261   :  { %v787_v5 = vpop.eup %786  ;;  %798 = vtanh.f32 %v511_v0  ;;  %663 = vmatpush.bf16.msrb.mxu0 %v776_v62 }
 0x262   :  { %v789_v6 = vpop.eup %788  ;;  %800 = vtanh.f32 %v512_v3  ;;  %v394_v15 = vadd.f32 1.0, %v787_v5 }
 0x263   :  { %v791_v7 = vpop.eup %790  ;;  %v393_v16 = vadd.f32 1.0, %v789_v6 }
 0x264   :  { %v793_v10 = vpop.eup %792  ;;  %v517_v20 = vadd.f32 1.0, %v791_v7 }
 0x265   :  { %v795_v17 = vpop.eup %794  ;;  %v518_v23 = vadd.f32 1.0, %v793_v10 }
 0x266   :  { %v797_v22 = vpop.eup %796  ;;  %v395_v43 = vadd.f32 1.0, %v795_v17 }
 0x267   :  { %v799_v26 = vpop.eup %798  ;;  %v396_v45 = vadd.f32 1.0, %v797_v22 }
 0x268   :  { %v801_v32 = vpop.eup %800  ;;  %v519_v44 = vadd.f32 1.0, %v799_v26 }
 0x269   :  { %v520_v46 = vadd.f32 1.0, %v801_v32 }
 0x26d   :  { %v288_v59 = vpop.permute.xlu1 %287 }
 0x26e   :  { %290 = vst.msk [vmem:[#allocation3 + $0x2] sm:$0x3] %vm236_vm7, %v288_v59 }
 0x275   :  { %v379_v8 = vld [vmem:[#allocation3] ss:$2 sm:$0x3]  ;;  %v503_v9 = vld [vmem:[#allocation3 + $0x1] ss:$2 sm:$0x3] }
 0x276   :  { %v399_v11 = vperm.slane %v379_v8, 1  ;;  %v398_v12 = vperm.slane %v379_v8, 0  ;;  %v522_v13 = vperm.slane %v503_v9, 0  ;;  %v523_v14 = vperm.slane %v503_v9, 1 }
 0x278   :  { %v403_v18 = vmul.f32 %v399_v11, %v372_v4  ;;  %v402_v19 = vmul.f32 %v398_v12, %v349_v2  ;;  %v526_v21 = vmul.f32 %v522_v13, %v471_v61  ;;  %v527_v24 = vmul.f32 %v523_v14, %v494_v63  ;;  %v775_v63 = vld [vmem:[%s1135_s7] sm:$0xff]  ;;  %s839_s7 = smov [#allocation4]  }
 0x279   :  { %v404_v36 = vmul.f32 %v398_v12, %v352_v33  ;;  %v528_v39 = vmul.f32 %v522_v13, %v474_v25  ;;  %v405_v41 = vmul.f32 %v399_v11, %v375_v38  ;;  %v529_v42 = vmul.f32 %v523_v14, %v497_v31  ;;  %664 = vmatpush.bf16.msrb.mxu0 %v775_v63 }
 0x27a   :  { %v407_v27 = vmul.f32 %v403_v18, %v394_v15  ;;  %v406_v28 = vmul.f32 %v402_v19, %v393_v16  ;;  %v530_v29 = vmul.f32 %v526_v21, %v517_v20  ;;  %v531_v35 = vmul.f32 %v527_v24, %v518_v23 }
 0x27b   :  { %v408_v47 = vmul.f32 %v404_v36, %v395_v43  ;;  %v532_v48 = vmul.f32 %v528_v39, %v519_v44  ;;  %v409_v49 = vmul.f32 %v405_v41, %v396_v45  ;;  %v533_v50 = vmul.f32 %v529_v42, %v520_v46 }
 0x27c   :  { %v534_v37 = vadd.f32 %v530_v29, %v406_v28  ;;  %v535_v40 = vadd.f32 %v531_v35, %v407_v27 }
 0x27d   :  { %v536_v51 = vadd.f32 %v532_v48, %v408_v47  ;;  %v537_v52 = vadd.f32 %v533_v50, %v409_v49 }
 0x27e   :  { %586 = vmatmul.f32.vlgmr.msra.gmra.mxu1 %v534_v37  ;;  %609 = vmatmul.f32.vlgmr.msra.gmra.mxu2 %v535_v40 }
 0x286   :  { %589 = vmatmul.f32.gmra.mxu1 %v536_v51  ;;  %612 = vmatmul.f32.gmra.mxu2 %v537_v52 }
 0x2fb   :  { %v587_v53 = vpop.f32.mrf.mxu1 }
 0x301   :  { %v610_v54 = vpop.f32.mrf.mxu2 }
 0x302   :  { %v611_v55 = vadd.f32 %v610_v54, %v587_v53 }
 0x303   :  { %v590_v56 = vpop.f32.mrf.mxu1 }
 0x304   :  { %v616_v59 = vadd.f32 %v611_v55, %v956_v30 }
 0x309   :  { %v613_v57 = vpop.f32.mrf.mxu2 }
 0x30a   :  { %v614_v58 = vadd.f32 %v613_v57, %v590_v56 }
 0x30c   :  { %v617_v60 = vadd.f32 %v614_v58, %v960_v34  ;;  %v785_v34 = vld [vmem:[%s1136_s8] ss:$0 sm:$0xff]  ;;  %s697_s8 = sshll.u32 %s839_s7, 4  ;;  %s698_s8 = int_to_ptr.vmem [resolvable:$true] %s697_s8 }
 0x30e   :  { %v618_v61 = vpack.c.bf16 %v617_v60, %v616_v59 }
 0x310   :  { %626 = vmatpush.bf16.msra.mxu3 %v618_v61 }
 0x313   :  { %757 = vmatmul.msk.bf16.vlgmr.msra.gmra.mxu3 %vm52_vm0, %v903_v1 }
 0x396   :  { %v628_v0 = vpop.f32.mrf.mxu3 }
 0x39e   :  { %v630_v2 = vpop.f32.mrf.mxu3 }
 0x39f   :  { %v633_v30 = vpack.c.bf16 %v630_v2, %v628_v0 }
 0x3a1   :  { %766 = vmatmul.msk.bf16.vlgmr.msrb.gmra.mxu0 %vm141_vm4, %v633_v30 }
 0x41e   :  { %v666_v1 = vpop.f32.mrf.mxu0 }
 0x41f   :  { %v667_v3 = vadd.f32 %v785_v34, %v666_v1 }
 0x421   :  { %671 = vmax.xlane.f32.xlu2 %v667_v3 }
 0x426   :  { %v668_v4 = vpop.f32.mrf.mxu0 }
 0x427   :  { %v669_v5 = vadd.f32 %v785_v34, %v668_v4 }
 0x429   :  { %673 = vmax.xlane.f32.xlu1 %v669_v5 }
 0x494   :  { %v672_v6 = vpop.xlane.xlu2 %671 }
 0x495   :  { %v675_v7 = vsub.f32 %v667_v3, %v672_v6 }
 0x497   :  { %v677_v8 = vmul.f32 1.442695, %v675_v7 }
 0x499   :  { %802 = vpow2.f32 %v677_v8 }
 0x49c   :  { %v674_v9 = vpop.xlane.xlu1 %673 }
 0x49d   :  { %v676_v10 = vsub.f32 %v669_v5, %v674_v9 }
 0x49f   :  { %v803_v11 = vpop.eup %802  ;;  %v679_v12 = vmul.f32 1.442695, %v676_v10 }
 0x4a0   :  { %681 = vadd.xlane.f32.xlu2 %v803_v11 }
 0x4a1   :  { %804 = vpow2.f32 %v679_v12 }
 0x4a7   :  { %v805_v13 = vpop.eup %804 }
 0x4a8   :  { %683 = vadd.xlane.f32.xlu2 %v805_v13 }
 0x513   :  { %v682_v14 = vpop.xlane.xlu2 %681 }
 0x514   :  { %806 = vlog2.f32 %v682_v14 }
 0x51a   :  { %v807_v15 = vpop.eup %806 }
 0x51b   :  { %v686_v16 = vmul.f32 0.6931472, %v807_v15  ;;  %v684_v17 = vpop.xlane.xlu2 %683 }
 0x51c   :  { %808 = vlog2.f32 %v684_v17 }
 0x51d   :  { %v689_v18 = vsub.f32 %v675_v7, %v686_v16 }
 0x51f   :  { %691 = vst [vmem:[#allocation4] sm:$0xff] %v689_v18 }
 0x522   :  { %v809_v19 = vpop.eup %808 }
 0x523   :  { %v688_v20 = vmul.f32 0.6931472, %v809_v19 }
 0x525   :  { %v690_v21 = vsub.f32 %v676_v10, %v688_v20 }
 0x527   :  { %692 = vst [vmem:[#allocation4 + $0x8] sm:$0xff] %v690_v21 }
 0x528   :  { %705 = dma.vmem_to_hbm [thread:$0]  %s698_s8, 256, %s700_s21, [#allocation5], %s840_s22, %s840_s22, %s841_s5  }
 0x529   :  { %834 = dma.done.wait [#allocation5], 256  }
 0x52a   :  { %835 = vsyncadd [#allocation5], 4294967040 }
 0x52b   :  { %710 = vsyncpa [#allocation5], 1 }

</bundles_post_ra>
